<compile_context>
chip_gen: v5e
topology: v5e:2x2
jax: 0.10.0
libtpu: 0.0.40
codegen_flags: <defaults>
</compile_context>

<pallas_src>
import jax
import jax.numpy as jnp
from jax.experimental import pallas as pl
from jax.experimental.pallas import tpu as pltpu

CONNECT_3 = [[0, 1, 2], [1, 2, 3], [2, 3, 4], [3, 4, 5], [0, 4, 5], [0, 1, 5]]
CONNECT_4 = [[0, 1, 2, 3], [1, 2, 3, 4], [2, 3, 4, 5], [1, 3, 4, 5], [1, 2, 4, 5],
             [1, 2, 3, 5], [0, 1, 3, 4], [1, 2, 4, 5], [0, 2, 3, 5]]
CONNECT_6 = [0, 1, 2, 3, 4, 5]

KH = KW = 5
C_IN = 6
C_OUT = len(CONNECT_3) + len(CONNECT_4) + 1      # 16
MAX_B_BLK = 64                                   # images per grid step (upper bound)


@jax.jit
def lenet_c3_forward(x_nchw, w_oihw, bias):
    """x: (N, 6, H, W) f32 -> (N, 16, H-4, W-4) f32 (PyTorch NCHW semantics)."""
    N, C, H, W = x_nchw.shape
    assert C == C_IN
    Ho, Wo = H - KH + 1, W - KW + 1
    HW = H * W
    # Lane headroom: the largest tap shift is (KH-1)*W + (KW-1); pad the
    # flattened image so every shifted slice stays in bounds (rounded up to a
    # multiple of 128 lanes).  Valid output positions never read the padding.
    shift_max = (KH - 1) * W + (KW - 1)
    P = -(-(HW + shift_max) // 128) * 128

    # ---- batch blocking: large blocks, but keep >= 2 grid steps (v7x: 2 TCs) ----
    n_blocks = max(2, -(-N // MAX_B_BLK)) if N > 1 else 1
    b_blk = -(-N // n_blocks)
    n_blocks = -(-N // b_blk)
    n_pad = n_blocks * b_blk

    # ---- cheap layout prep on the RAW input (a few KB/image), NOT on patches ----
    xb = x_nchw
    if n_pad != N:
        xb = jnp.pad(xb, ((0, n_pad - N), (0, 0), (0, 0), (0, 0)))
    xb = xb.astype(jnp.bfloat16).reshape(n_pad, C_IN, HW)
    xb = jnp.pad(xb, ((0, 0), (0, 0), (0, P - HW)))            # (n_pad, 6, P)

    # Per-tap weight layout: w_taps[t, co, ci] = W[co, ci, dy, dx], t = dy*KW+dx.
    w_taps = w_oihw.transpose(2, 3, 0, 1).reshape(KH * KW, C_OUT, C_IN)
    w_taps = w_taps.astype(jnp.bfloat16)                       # (25, 16, 6)
    b_col = bias.reshape(C_OUT, 1).astype(jnp.float32)         # (16, 1)

    def _c3_kernel(x_ref, w_ref, b_ref, o_ref):
        # x_ref: (b_blk, 6, P)      bf16  flattened raw images (+ lane headroom)
        # w_ref: (25, 16, 6)        bf16  per-tap dense weights
        # b_ref: (16, 1)            f32   bias
        # o_ref: (b_blk, 16, HW)    f32   full-grid conv output (cropped later)
        w_all = w_ref[...]                                     # hoisted per step
        bias_b = jnp.broadcast_to(b_ref[...], (C_OUT, HW))     # hoisted broadcast

        def per_image(i, carry):
            xi = x_ref[i]                                      # (6, P) bf16
            acc = jnp.zeros((C_OUT, HW), jnp.float32)
            # in-VMEM im2col: tap (dy, dx) == static lane shift by dy*W + dx.
            for t in range(KH * KW):                           # 25, unrolled
                s = (t // KW) * W + (t % KW)
                acc = acc + jnp.dot(w_all[t], xi[:, s:s + HW],
                                    preferred_element_type=jnp.float32)
            o_ref[i] = acc + bias_b
            return carry

        jax.lax.fori_loop(0, x_ref.shape[0], per_image, 0)

    out_full = pl.pallas_call(
        _c3_kernel,
        out_shape=jax.ShapeDtypeStruct((n_pad, C_OUT, HW), jnp.float32),
        grid_spec=pltpu.PrefetchScalarGridSpec(
            num_scalar_prefetch=0,
            grid=(n_blocks,),
            in_specs=[
                pl.BlockSpec((b_blk, C_IN, P), lambda n: (n, 0, 0)),
                pl.BlockSpec((KH * KW, C_OUT, C_IN), lambda n: (0, 0, 0)),
                pl.BlockSpec((C_OUT, 1), lambda n: (0, 0)),
            ],
            out_specs=pl.BlockSpec((b_blk, C_OUT, HW), lambda n: (n, 0, 0)),
        ),
        compiler_params=pltpu.CompilerParams(
            dimension_semantics=("parallel",)),                # batch -> both TCs
    )(xb, w_taps, b_col)

    # Full HxW conv grid -> crop the valid (Ho, Wo) window.  Contiguous reshape
    # plus a cheap (~16 KB/image) slice; no transposes.
    return out_full.reshape(n_pad, C_OUT, H, W)[:N, :, :Ho, :Wo]


def init_params(key):
    """Deterministic init matching the nn.Conv2d shapes in LeNet_C3.__init__."""
    k_w3, k_w4, k_w6, k_b = jax.random.split(key, 4)

    def unif(k, shape, fan_in):
        bound = 1.0 / (fan_in ** 0.5)
        return jax.random.uniform(k, shape, jnp.float32, -bound, bound)

    w3 = unif(k_w3, (len(CONNECT_3), 3, KH, KW), 3 * KH * KW)
    w4 = unif(k_w4, (len(CONNECT_4), 4, KH, KW), 4 * KH * KW)
    w6 = unif(k_w6, (1, C_IN, KH, KW), C_IN * KH * KW)
    kb3, kb4, kb6 = jax.random.split(k_b, 3)
    b3 = unif(kb3, (len(CONNECT_3),), 3 * KH * KW)
    b4 = unif(kb4, (len(CONNECT_4),), 4 * KH * KW)
    b6 = unif(kb6, (1,), C_IN * KH * KW)

    # Embed the partially-connected convs into one dense (Cout, Cin, KH, KW)
    # weight; disconnected input channels stay zero.
    W = jnp.zeros((C_OUT, C_IN, KH, KW), jnp.float32)
    co = 0
    for i, conn in enumerate(CONNECT_3):
        W = W.at[co, jnp.array(conn)].set(w3[i]); co += 1
    for i, conn in enumerate(CONNECT_4):
        W = W.at[co, jnp.array(conn)].set(w4[i]); co += 1
    W = W.at[co, jnp.array(CONNECT_6)].set(w6[0])
    bias = jnp.concatenate([b3, b4, b6])
    return W, bias


def _reference(x_nchw, w_oihw, bias):
    out = jax.lax.conv_general_dilated(
        x_nchw, w_oihw, window_strides=(1, 1), padding="VALID",
        dimension_numbers=("NCHW", "OIHW", "NCHW"),
        precision=jax.lax.Precision.HIGHEST)
    return out + bias[None, :, None, None]


if __name__ == "__main__":
    key = jax.random.PRNGKey(0)
    k_x, k_p = jax.random.split(key)

    # LeNet C3 expects 6 input feature maps (S2); small spatial size 16x16.
    x = jax.random.normal(k_x, (2, C_IN, 16, 16), dtype=jnp.float32)
    W, bias = init_params(k_p)

    # Round test data onto the bf16 grid so the correctness check is insensitive
    # to the kernel's (documented) bf16-operand choice: products are then exact
    # on both paths; only ~1e-6 f32 accumulation-order noise remains.
    x = x.astype(jnp.bfloat16).astype(jnp.float32)
    W = W.astype(jnp.bfloat16).astype(jnp.float32)
    bias = bias.astype(jnp.bfloat16).astype(jnp.float32)

    out = jax.block_until_ready(lenet_c3_forward(x, W, bias))
    ref = _reference(x, W, bias)

    assert out.shape == (2, C_OUT, 12, 12), out.shape
    assert jnp.allclose(out, ref, atol=1e-4, rtol=1e-4), "mismatch vs reference conv"

    print("KERNEL_OK")
</pallas_src>

<mosaic_0001>
module attributes {stable_mosaic.version = 11 : i64} {
  func.func @_c3_kernel(%arg0: i32, %arg1: memref<1x6x384xbf16, #tpu.memory_space<vmem>>, %arg2: memref<25x16x6xbf16, #tpu.memory_space<vmem>>, %arg3: memref<16x1xf32, #tpu.memory_space<vmem>>, %arg4: memref<1x16x256xf32, #tpu.memory_space<vmem>>) attributes {dimension_semantics = [#tpu.dimension_semantics<parallel>], iteration_bounds = array<i64: 2>, scalar_prefetch = 0 : i64, scratch_operands = 0 : i64, tpu.core_type = #tpu.core_type<tc>, window_params = [{transform_indices = @transform_0, window_bounds = array<i64: 1, 6, 384>}, {pipeline_mode = #tpu.pipeline_mode<synchronous>, transform_indices = @transform_1, window_bounds = array<i64: 25, 16, 6>}, {pipeline_mode = #tpu.pipeline_mode<synchronous>, transform_indices = @transform_2, window_bounds = array<i64: 16, 1>}, {transform_indices = @transform_3, window_bounds = array<i64: 1, 16, 256>}]} {
    %c0 = arith.constant 0 : index
    %c0_0 = arith.constant 0 : index
    %c0_1 = arith.constant 0 : index
    %0 = vector.load %arg2[%c0, %c0_0, %c0_1] : memref<25x16x6xbf16, #tpu.memory_space<vmem>>, vector<25x16x6xbf16>
    %c0_2 = arith.constant 0 : index
    %c0_3 = arith.constant 0 : index
    %1 = vector.load %arg3[%c0_2, %c0_3] : memref<16x1xf32, #tpu.memory_space<vmem>>, vector<16x1xf32>
    %2 = vector.shape_cast %1 : vector<16x1xf32> to vector<16x1xf32>
    %3 = vector.broadcast %2 : vector<16x1xf32> to vector<16x256xf32>
    %c0_i32 = arith.constant 0 : i32
    %4 = arith.index_cast %c0_i32 : i32 to index
    %c0_4 = arith.constant 0 : index
    %c0_5 = arith.constant 0 : index
    %5 = vector.load %arg1[%4, %c0_4, %c0_5] : memref<1x6x384xbf16, #tpu.memory_space<vmem>>, vector<1x6x384xbf16>
    %6 = vector.shape_cast %5 : vector<1x6x384xbf16> to vector<6x384xbf16>
    %cst = arith.constant 0.000000e+00 : f32
    %7 = vector.broadcast %cst : f32 to vector<16x256xf32>
    %8 = vector.extract_strided_slice %0 {offsets = [0, 0, 0], sizes = [1, 16, 6], strides = [1, 1, 1]} : vector<25x16x6xbf16> to vector<1x16x6xbf16>
    %9 = vector.shape_cast %8 : vector<1x16x6xbf16> to vector<16x6xbf16>
    %10 = vector.extract_strided_slice %6 {offsets = [0, 0], sizes = [6, 256], strides = [1, 1]} : vector<6x384xbf16> to vector<6x256xbf16>
    %cst_6 = arith.constant dense<0.000000e+00> : vector<16x256xf32>
    %11 = tpu.matmul %9, %10, %cst_6 {dimension_numbers = #tpu.dot_dimension_numbers<[1], [0], [0], [1], [0, 0, 1, 1], [], []>} : vector<16x6xbf16>, vector<6x256xbf16>, vector<16x256xf32> -> vector<16x256xf32>
    %12 = arith.addf %7, %11 : vector<16x256xf32>
    %13 = vector.extract_strided_slice %0 {offsets = [1, 0, 0], sizes = [1, 16, 6], strides = [1, 1, 1]} : vector<25x16x6xbf16> to vector<1x16x6xbf16>
    %14 = vector.shape_cast %13 : vector<1x16x6xbf16> to vector<16x6xbf16>
    %15 = vector.extract_strided_slice %6 {offsets = [0, 1], sizes = [6, 256], strides = [1, 1]} : vector<6x384xbf16> to vector<6x256xbf16>
    %cst_7 = arith.constant dense<0.000000e+00> : vector<16x256xf32>
    %16 = tpu.matmul %14, %15, %cst_7 {dimension_numbers = #tpu.dot_dimension_numbers<[1], [0], [0], [1], [0, 0, 1, 1], [], []>} : vector<16x6xbf16>, vector<6x256xbf16>, vector<16x256xf32> -> vector<16x256xf32>
    %17 = arith.addf %12, %16 : vector<16x256xf32>
    %18 = vector.extract_strided_slice %0 {offsets = [2, 0, 0], sizes = [1, 16, 6], strides = [1, 1, 1]} : vector<25x16x6xbf16> to vector<1x16x6xbf16>
    %19 = vector.shape_cast %18 : vector<1x16x6xbf16> to vector<16x6xbf16>
    %20 = vector.extract_strided_slice %6 {offsets = [0, 2], sizes = [6, 256], strides = [1, 1]} : vector<6x384xbf16> to vector<6x256xbf16>
    %cst_8 = arith.constant dense<0.000000e+00> : vector<16x256xf32>
    %21 = tpu.matmul %19, %20, %cst_8 {dimension_numbers = #tpu.dot_dimension_numbers<[1], [0], [0], [1], [0, 0, 1, 1], [], []>} : vector<16x6xbf16>, vector<6x256xbf16>, vector<16x256xf32> -> vector<16x256xf32>
    %22 = arith.addf %17, %21 : vector<16x256xf32>
    %23 = vector.extract_strided_slice %0 {offsets = [3, 0, 0], sizes = [1, 16, 6], strides = [1, 1, 1]} : vector<25x16x6xbf16> to vector<1x16x6xbf16>
    %24 = vector.shape_cast %23 : vector<1x16x6xbf16> to vector<16x6xbf16>
    %25 = vector.extract_strided_slice %6 {offsets = [0, 3], sizes = [6, 256], strides = [1, 1]} : vector<6x384xbf16> to vector<6x256xbf16>
    %cst_9 = arith.constant dense<0.000000e+00> : vector<16x256xf32>
    %26 = tpu.matmul %24, %25, %cst_9 {dimension_numbers = #tpu.dot_dimension_numbers<[1], [0], [0], [1], [0, 0, 1, 1], [], []>} : vector<16x6xbf16>, vector<6x256xbf16>, vector<16x256xf32> -> vector<16x256xf32>
    %27 = arith.addf %22, %26 : vector<16x256xf32>
    %28 = vector.extract_strided_slice %0 {offsets = [4, 0, 0], sizes = [1, 16, 6], strides = [1, 1, 1]} : vector<25x16x6xbf16> to vector<1x16x6xbf16>
    %29 = vector.shape_cast %28 : vector<1x16x6xbf16> to vector<16x6xbf16>
    %30 = vector.extract_strided_slice %6 {offsets = [0, 4], sizes = [6, 256], strides = [1, 1]} : vector<6x384xbf16> to vector<6x256xbf16>
    %cst_10 = arith.constant dense<0.000000e+00> : vector<16x256xf32>
    %31 = tpu.matmul %29, %30, %cst_10 {dimension_numbers = #tpu.dot_dimension_numbers<[1], [0], [0], [1], [0, 0, 1, 1], [], []>} : vector<16x6xbf16>, vector<6x256xbf16>, vector<16x256xf32> -> vector<16x256xf32>
    %32 = arith.addf %27, %31 : vector<16x256xf32>
    %33 = vector.extract_strided_slice %0 {offsets = [5, 0, 0], sizes = [1, 16, 6], strides = [1, 1, 1]} : vector<25x16x6xbf16> to vector<1x16x6xbf16>
    %34 = vector.shape_cast %33 : vector<1x16x6xbf16> to vector<16x6xbf16>
    %35 = vector.extract_strided_slice %6 {offsets = [0, 16], sizes = [6, 256], strides = [1, 1]} : vector<6x384xbf16> to vector<6x256xbf16>
    %cst_11 = arith.constant dense<0.000000e+00> : vector<16x256xf32>
    %36 = tpu.matmul %34, %35, %cst_11 {dimension_numbers = #tpu.dot_dimension_numbers<[1], [0], [0], [1], [0, 0, 1, 1], [], []>} : vector<16x6xbf16>, vector<6x256xbf16>, vector<16x256xf32> -> vector<16x256xf32>
    %37 = arith.addf %32, %36 : vector<16x256xf32>
    %38 = vector.extract_strided_slice %0 {offsets = [6, 0, 0], sizes = [1, 16, 6], strides = [1, 1, 1]} : vector<25x16x6xbf16> to vector<1x16x6xbf16>
    %39 = vector.shape_cast %38 : vector<1x16x6xbf16> to vector<16x6xbf16>
    %40 = vector.extract_strided_slice %6 {offsets = [0, 17], sizes = [6, 256], strides = [1, 1]} : vector<6x384xbf16> to vector<6x256xbf16>
    %cst_12 = arith.constant dense<0.000000e+00> : vector<16x256xf32>
    %41 = tpu.matmul %39, %40, %cst_12 {dimension_numbers = #tpu.dot_dimension_numbers<[1], [0], [0], [1], [0, 0, 1, 1], [], []>} : vector<16x6xbf16>, vector<6x256xbf16>, vector<16x256xf32> -> vector<16x256xf32>
    %42 = arith.addf %37, %41 : vector<16x256xf32>
    %43 = vector.extract_strided_slice %0 {offsets = [7, 0, 0], sizes = [1, 16, 6], strides = [1, 1, 1]} : vector<25x16x6xbf16> to vector<1x16x6xbf16>
    %44 = vector.shape_cast %43 : vector<1x16x6xbf16> to vector<16x6xbf16>
    %45 = vector.extract_strided_slice %6 {offsets = [0, 18], sizes = [6, 256], strides = [1, 1]} : vector<6x384xbf16> to vector<6x256xbf16>
    %cst_13 = arith.constant dense<0.000000e+00> : vector<16x256xf32>
    %46 = tpu.matmul %44, %45, %cst_13 {dimension_numbers = #tpu.dot_dimension_numbers<[1], [0], [0], [1], [0, 0, 1, 1], [], []>} : vector<16x6xbf16>, vector<6x256xbf16>, vector<16x256xf32> -> vector<16x256xf32>
    %47 = arith.addf %42, %46 : vector<16x256xf32>
    %48 = vector.extract_strided_slice %0 {offsets = [8, 0, 0], sizes = [1, 16, 6], strides = [1, 1, 1]} : vector<25x16x6xbf16> to vector<1x16x6xbf16>
    %49 = vector.shape_cast %48 : vector<1x16x6xbf16> to vector<16x6xbf16>
    %50 = vector.extract_strided_slice %6 {offsets = [0, 19], sizes = [6, 256], strides = [1, 1]} : vector<6x384xbf16> to vector<6x256xbf16>
    %cst_14 = arith.constant dense<0.000000e+00> : vector<16x256xf32>
    %51 = tpu.matmul %49, %50, %cst_14 {dimension_numbers = #tpu.dot_dimension_numbers<[1], [0], [0], [1], [0, 0, 1, 1], [], []>} : vector<16x6xbf16>, vector<6x256xbf16>, vector<16x256xf32> -> vector<16x256xf32>
    %52 = arith.addf %47, %51 : vector<16x256xf32>
    %53 = vector.extract_strided_slice %0 {offsets = [9, 0, 0], sizes = [1, 16, 6], strides = [1, 1, 1]} : vector<25x16x6xbf16> to vector<1x16x6xbf16>
    %54 = vector.shape_cast %53 : vector<1x16x6xbf16> to vector<16x6xbf16>
    %55 = vector.extract_strided_slice %6 {offsets = [0, 20], sizes = [6, 256], strides = [1, 1]} : vector<6x384xbf16> to vector<6x256xbf16>
    %cst_15 = arith.constant dense<0.000000e+00> : vector<16x256xf32>
    %56 = tpu.matmul %54, %55, %cst_15 {dimension_numbers = #tpu.dot_dimension_numbers<[1], [0], [0], [1], [0, 0, 1, 1], [], []>} : vector<16x6xbf16>, vector<6x256xbf16>, vector<16x256xf32> -> vector<16x256xf32>
    %57 = arith.addf %52, %56 : vector<16x256xf32>
    %58 = vector.extract_strided_slice %0 {offsets = [10, 0, 0], sizes = [1, 16, 6], strides = [1, 1, 1]} : vector<25x16x6xbf16> to vector<1x16x6xbf16>
    %59 = vector.shape_cast %58 : vector<1x16x6xbf16> to vector<16x6xbf16>
    %60 = vector.extract_strided_slice %6 {offsets = [0, 32], sizes = [6, 256], strides = [1, 1]} : vector<6x384xbf16> to vector<6x256xbf16>
    %cst_16 = arith.constant dense<0.000000e+00> : vector<16x256xf32>
    %61 = tpu.matmul %59, %60, %cst_16 {dimension_numbers = #tpu.dot_dimension_numbers<[1], [0], [0], [1], [0, 0, 1, 1], [], []>} : vector<16x6xbf16>, vector<6x256xbf16>, vector<16x256xf32> -> vector<16x256xf32>
    %62 = arith.addf %57, %61 : vector<16x256xf32>
    %63 = vector.extract_strided_slice %0 {offsets = [11, 0, 0], sizes = [1, 16, 6], strides = [1, 1, 1]} : vector<25x16x6xbf16> to vector<1x16x6xbf16>
    %64 = vector.shape_cast %63 : vector<1x16x6xbf16> to vector<16x6xbf16>
    %65 = vector.extract_strided_slice %6 {offsets = [0, 33], sizes = [6, 256], strides = [1, 1]} : vector<6x384xbf16> to vector<6x256xbf16>
    %cst_17 = arith.constant dense<0.000000e+00> : vector<16x256xf32>
    %66 = tpu.matmul %64, %65, %cst_17 {dimension_numbers = #tpu.dot_dimension_numbers<[1], [0], [0], [1], [0, 0, 1, 1], [], []>} : vector<16x6xbf16>, vector<6x256xbf16>, vector<16x256xf32> -> vector<16x256xf32>
    %67 = arith.addf %62, %66 : vector<16x256xf32>
    %68 = vector.extract_strided_slice %0 {offsets = [12, 0, 0], sizes = [1, 16, 6], strides = [1, 1, 1]} : vector<25x16x6xbf16> to vector<1x16x6xbf16>
    %69 = vector.shape_cast %68 : vector<1x16x6xbf16> to vector<16x6xbf16>
    %70 = vector.extract_strided_slice %6 {offsets = [0, 34], sizes = [6, 256], strides = [1, 1]} : vector<6x384xbf16> to vector<6x256xbf16>
    %cst_18 = arith.constant dense<0.000000e+00> : vector<16x256xf32>
    %71 = tpu.matmul %69, %70, %cst_18 {dimension_numbers = #tpu.dot_dimension_numbers<[1], [0], [0], [1], [0, 0, 1, 1], [], []>} : vector<16x6xbf16>, vector<6x256xbf16>, vector<16x256xf32> -> vector<16x256xf32>
    %72 = arith.addf %67, %71 : vector<16x256xf32>
    %73 = vector.extract_strided_slice %0 {offsets = [13, 0, 0], sizes = [1, 16, 6], strides = [1, 1, 1]} : vector<25x16x6xbf16> to vector<1x16x6xbf16>
    %74 = vector.shape_cast %73 : vector<1x16x6xbf16> to vector<16x6xbf16>
    %75 = vector.extract_strided_slice %6 {offsets = [0, 35], sizes = [6, 256], strides = [1, 1]} : vector<6x384xbf16> to vector<6x256xbf16>
    %cst_19 = arith.constant dense<0.000000e+00> : vector<16x256xf32>
    %76 = tpu.matmul %74, %75, %cst_19 {dimension_numbers = #tpu.dot_dimension_numbers<[1], [0], [0], [1], [0, 0, 1, 1], [], []>} : vector<16x6xbf16>, vector<6x256xbf16>, vector<16x256xf32> -> vector<16x256xf32>
    %77 = arith.addf %72, %76 : vector<16x256xf32>
    %78 = vector.extract_strided_slice %0 {offsets = [14, 0, 0], sizes = [1, 16, 6], strides = [1, 1, 1]} : vector<25x16x6xbf16> to vector<1x16x6xbf16>
    %79 = vector.shape_cast %78 : vector<1x16x6xbf16> to vector<16x6xbf16>
    %80 = vector.extract_strided_slice %6 {offsets = [0, 36], sizes = [6, 256], strides = [1, 1]} : vector<6x384xbf16> to vector<6x256xbf16>
    %cst_20 = arith.constant dense<0.000000e+00> : vector<16x256xf32>
    %81 = tpu.matmul %79, %80, %cst_20 {dimension_numbers = #tpu.dot_dimension_numbers<[1], [0], [0], [1], [0, 0, 1, 1], [], []>} : vector<16x6xbf16>, vector<6x256xbf16>, vector<16x256xf32> -> vector<16x256xf32>
    %82 = arith.addf %77, %81 : vector<16x256xf32>
    %83 = vector.extract_strided_slice %0 {offsets = [15, 0, 0], sizes = [1, 16, 6], strides = [1, 1, 1]} : vector<25x16x6xbf16> to vector<1x16x6xbf16>
    %84 = vector.shape_cast %83 : vector<1x16x6xbf16> to vector<16x6xbf16>
    %85 = vector.extract_strided_slice %6 {offsets = [0, 48], sizes = [6, 256], strides = [1, 1]} : vector<6x384xbf16> to vector<6x256xbf16>
    %cst_21 = arith.constant dense<0.000000e+00> : vector<16x256xf32>
    %86 = tpu.matmul %84, %85, %cst_21 {dimension_numbers = #tpu.dot_dimension_numbers<[1], [0], [0], [1], [0, 0, 1, 1], [], []>} : vector<16x6xbf16>, vector<6x256xbf16>, vector<16x256xf32> -> vector<16x256xf32>
    %87 = arith.addf %82, %86 : vector<16x256xf32>
    %88 = vector.extract_strided_slice %0 {offsets = [16, 0, 0], sizes = [1, 16, 6], strides = [1, 1, 1]} : vector<25x16x6xbf16> to vector<1x16x6xbf16>
    %89 = vector.shape_cast %88 : vector<1x16x6xbf16> to vector<16x6xbf16>
    %90 = vector.extract_strided_slice %6 {offsets = [0, 49], sizes = [6, 256], strides = [1, 1]} : vector<6x384xbf16> to vector<6x256xbf16>
    %cst_22 = arith.constant dense<0.000000e+00> : vector<16x256xf32>
    %91 = tpu.matmul %89, %90, %cst_22 {dimension_numbers = #tpu.dot_dimension_numbers<[1], [0], [0], [1], [0, 0, 1, 1], [], []>} : vector<16x6xbf16>, vector<6x256xbf16>, vector<16x256xf32> -> vector<16x256xf32>
    %92 = arith.addf %87, %91 : vector<16x256xf32>
    %93 = vector.extract_strided_slice %0 {offsets = [17, 0, 0], sizes = [1, 16, 6], strides = [1, 1, 1]} : vector<25x16x6xbf16> to vector<1x16x6xbf16>
    %94 = vector.shape_cast %93 : vector<1x16x6xbf16> to vector<16x6xbf16>
    %95 = vector.extract_strided_slice %6 {offsets = [0, 50], sizes = [6, 256], strides = [1, 1]} : vector<6x384xbf16> to vector<6x256xbf16>
    %cst_23 = arith.constant dense<0.000000e+00> : vector<16x256xf32>
    %96 = tpu.matmul %94, %95, %cst_23 {dimension_numbers = #tpu.dot_dimension_numbers<[1], [0], [0], [1], [0, 0, 1, 1], [], []>} : vector<16x6xbf16>, vector<6x256xbf16>, vector<16x256xf32> -> vector<16x256xf32>
    %97 = arith.addf %92, %96 : vector<16x256xf32>
    %98 = vector.extract_strided_slice %0 {offsets = [18, 0, 0], sizes = [1, 16, 6], strides = [1, 1, 1]} : vector<25x16x6xbf16> to vector<1x16x6xbf16>
    %99 = vector.shape_cast %98 : vector<1x16x6xbf16> to vector<16x6xbf16>
    %100 = vector.extract_strided_slice %6 {offsets = [0, 51], sizes = [6, 256], strides = [1, 1]} : vector<6x384xbf16> to vector<6x256xbf16>
    %cst_24 = arith.constant dense<0.000000e+00> : vector<16x256xf32>
    %101 = tpu.matmul %99, %100, %cst_24 {dimension_numbers = #tpu.dot_dimension_numbers<[1], [0], [0], [1], [0, 0, 1, 1], [], []>} : vector<16x6xbf16>, vector<6x256xbf16>, vector<16x256xf32> -> vector<16x256xf32>
    %102 = arith.addf %97, %101 : vector<16x256xf32>
    %103 = vector.extract_strided_slice %0 {offsets = [19, 0, 0], sizes = [1, 16, 6], strides = [1, 1, 1]} : vector<25x16x6xbf16> to vector<1x16x6xbf16>
    %104 = vector.shape_cast %103 : vector<1x16x6xbf16> to vector<16x6xbf16>
    %105 = vector.extract_strided_slice %6 {offsets = [0, 52], sizes = [6, 256], strides = [1, 1]} : vector<6x384xbf16> to vector<6x256xbf16>
    %cst_25 = arith.constant dense<0.000000e+00> : vector<16x256xf32>
    %106 = tpu.matmul %104, %105, %cst_25 {dimension_numbers = #tpu.dot_dimension_numbers<[1], [0], [0], [1], [0, 0, 1, 1], [], []>} : vector<16x6xbf16>, vector<6x256xbf16>, vector<16x256xf32> -> vector<16x256xf32>
    %107 = arith.addf %102, %106 : vector<16x256xf32>
    %108 = vector.extract_strided_slice %0 {offsets = [20, 0, 0], sizes = [1, 16, 6], strides = [1, 1, 1]} : vector<25x16x6xbf16> to vector<1x16x6xbf16>
    %109 = vector.shape_cast %108 : vector<1x16x6xbf16> to vector<16x6xbf16>
    %110 = vector.extract_strided_slice %6 {offsets = [0, 64], sizes = [6, 256], strides = [1, 1]} : vector<6x384xbf16> to vector<6x256xbf16>
    %cst_26 = arith.constant dense<0.000000e+00> : vector<16x256xf32>
    %111 = tpu.matmul %109, %110, %cst_26 {dimension_numbers = #tpu.dot_dimension_numbers<[1], [0], [0], [1], [0, 0, 1, 1], [], []>} : vector<16x6xbf16>, vector<6x256xbf16>, vector<16x256xf32> -> vector<16x256xf32>
    %112 = arith.addf %107, %111 : vector<16x256xf32>
    %113 = vector.extract_strided_slice %0 {offsets = [21, 0, 0], sizes = [1, 16, 6], strides = [1, 1, 1]} : vector<25x16x6xbf16> to vector<1x16x6xbf16>
    %114 = vector.shape_cast %113 : vector<1x16x6xbf16> to vector<16x6xbf16>
    %115 = vector.extract_strided_slice %6 {offsets = [0, 65], sizes = [6, 256], strides = [1, 1]} : vector<6x384xbf16> to vector<6x256xbf16>
    %cst_27 = arith.constant dense<0.000000e+00> : vector<16x256xf32>
    %116 = tpu.matmul %114, %115, %cst_27 {dimension_numbers = #tpu.dot_dimension_numbers<[1], [0], [0], [1], [0, 0, 1, 1], [], []>} : vector<16x6xbf16>, vector<6x256xbf16>, vector<16x256xf32> -> vector<16x256xf32>
    %117 = arith.addf %112, %116 : vector<16x256xf32>
    %118 = vector.extract_strided_slice %0 {offsets = [22, 0, 0], sizes = [1, 16, 6], strides = [1, 1, 1]} : vector<25x16x6xbf16> to vector<1x16x6xbf16>
    %119 = vector.shape_cast %118 : vector<1x16x6xbf16> to vector<16x6xbf16>
    %120 = vector.extract_strided_slice %6 {offsets = [0, 66], sizes = [6, 256], strides = [1, 1]} : vector<6x384xbf16> to vector<6x256xbf16>
    %cst_28 = arith.constant dense<0.000000e+00> : vector<16x256xf32>
    %121 = tpu.matmul %119, %120, %cst_28 {dimension_numbers = #tpu.dot_dimension_numbers<[1], [0], [0], [1], [0, 0, 1, 1], [], []>} : vector<16x6xbf16>, vector<6x256xbf16>, vector<16x256xf32> -> vector<16x256xf32>
    %122 = arith.addf %117, %121 : vector<16x256xf32>
    %123 = vector.extract_strided_slice %0 {offsets = [23, 0, 0], sizes = [1, 16, 6], strides = [1, 1, 1]} : vector<25x16x6xbf16> to vector<1x16x6xbf16>
    %124 = vector.shape_cast %123 : vector<1x16x6xbf16> to vector<16x6xbf16>
    %125 = vector.extract_strided_slice %6 {offsets = [0, 67], sizes = [6, 256], strides = [1, 1]} : vector<6x384xbf16> to vector<6x256xbf16>
    %cst_29 = arith.constant dense<0.000000e+00> : vector<16x256xf32>
    %126 = tpu.matmul %124, %125, %cst_29 {dimension_numbers = #tpu.dot_dimension_numbers<[1], [0], [0], [1], [0, 0, 1, 1], [], []>} : vector<16x6xbf16>, vector<6x256xbf16>, vector<16x256xf32> -> vector<16x256xf32>
    %127 = arith.addf %122, %126 : vector<16x256xf32>
    %128 = vector.extract_strided_slice %0 {offsets = [24, 0, 0], sizes = [1, 16, 6], strides = [1, 1, 1]} : vector<25x16x6xbf16> to vector<1x16x6xbf16>
    %129 = vector.shape_cast %128 : vector<1x16x6xbf16> to vector<16x6xbf16>
    %130 = vector.extract_strided_slice %6 {offsets = [0, 68], sizes = [6, 256], strides = [1, 1]} : vector<6x384xbf16> to vector<6x256xbf16>
    %cst_30 = arith.constant dense<0.000000e+00> : vector<16x256xf32>
    %131 = tpu.matmul %129, %130, %cst_30 {dimension_numbers = #tpu.dot_dimension_numbers<[1], [0], [0], [1], [0, 0, 1, 1], [], []>} : vector<16x6xbf16>, vector<6x256xbf16>, vector<16x256xf32> -> vector<16x256xf32>
    %132 = arith.addf %127, %131 : vector<16x256xf32>
    %133 = arith.addf %132, %3 : vector<16x256xf32>
    %134 = arith.index_cast %c0_i32 : i32 to index
    %c0_31 = arith.constant 0 : index
    %c0_32 = arith.constant 0 : index
    %135 = vector.load %arg4[%134, %c0_31, %c0_32] : memref<1x16x256xf32, #tpu.memory_space<vmem>>, vector<1x16x256xf32>
    %136 = vector.shape_cast %135 : vector<1x16x256xf32> to vector<16x256xf32>
    %137 = vector.shape_cast %133 : vector<16x256xf32> to vector<1x16x256xf32>
    tpu.vector_store %arg4[%134, %c0_31, %c0_32], %137 {strides = array<i32>} : memref<1x16x256xf32, #tpu.memory_space<vmem>>, vector<1x16x256xf32>,
    %c1_i32 = arith.constant 1 : i32
    return
  }
  func.func @transform_0(%arg0: i32) -> (i32, i32, i32) {
    %c0_i32 = arith.constant 0 : i32
    %c0_i32_0 = arith.constant 0 : i32
    %c0_i32_1 = arith.constant 0 : i32
    return %arg0, %c0_i32, %c0_i32_0 : i32, i32, i32
  }
  func.func @transform_1(%arg0: i32) -> (i32, i32, i32) {
    %c0_i32 = arith.constant 0 : i32
    %c0_i32_0 = arith.constant 0 : i32
    %c0_i32_1 = arith.constant 0 : i32
    %c0_i32_2 = arith.constant 0 : i32
    return %c0_i32, %c0_i32_0, %c0_i32_1 : i32, i32, i32
  }
  func.func @transform_2(%arg0: i32) -> (i32, i32) {
    %c0_i32 = arith.constant 0 : i32
    %c0_i32_0 = arith.constant 0 : i32
    %c0_i32_1 = arith.constant 0 : i32
    return %c0_i32, %c0_i32_0 : i32, i32
  }
  func.func @transform_3(%arg0: i32) -> (i32, i32, i32) {
    %c0_i32 = arith.constant 0 : i32
    %c0_i32_0 = arith.constant 0 : i32
    %c0_i32_1 = arith.constant 0 : i32
    return %arg0, %c0_i32, %c0_i32_0 : i32, i32, i32
  }
}

</mosaic_0001>

<bundles_post_ra>
// kernel: lenet_c3_forward.1
= control target key start
LH: loop header
LB: loop body
LE: loop exit
PB: predicated region body
PF: predicated region fallthrough
CT: control target
= control target key end

     0   :  { %s1942_s12 = smov 0   ;;  %s2224_s0 = inlined_call_operand.vmem [shape: bf16[2,6,384], index: 0, kind: input, shape index: {}]   ;;  %s2225_s1 = inlined_call_operand.vmem [shape: bf16[25,16,6], index: 1, kind: input, shape index: {}]   ;;  %s2226_s2 = inlined_call_operand.vmem [shape: f32[16,1], index: 2, kind: input, shape index: {}]   ;;  %s2227_s3 = inlined_call_operand.vmem [shape: f32[2,16,256], index: 3, kind: output, shape index: {}]  }
   0x1 LB: > { %s1667_s13 = sadd.s32 4294967295, %s1895_s12   ;;  %p1671_p0 = scmp.ge.s32.totalorder %s1895_s12, 1  ;;  %s1895_s12 = sphi %s1942_s12, %s13_s12  }
   0x2   : > { %p137_p1 = scmp.lt.s32.totalorder %s1895_s12, 3 }
   0x4   : > { %p138_p2 = pnand %p1671_p0, %p137_p1 }
   0x5   : > { %p161_p3 = scmp.lt.s32.totalorder (!%p138_p2), %s1667_s13, 1  ;;  %s1897_s18 = smov (!%p138_p2), 127  }
   0x6   : > { %141 = sbr.rel (%p138_p2) target bundleno = 481 (0x1e1), region = 32  ;;  %s1898_s19 = smov (!%p138_p2), 126  }
   0x7   : > { %s1899_s20 = smov (!%p138_p2), 125   ;;  %s1900_s21 = smov (!%p138_p2), 124  }
   0x8   : > { %s1901_s22 = smov (!%p138_p2), 112   ;;  %s1902_s23 = smov (!%p138_p2), 111  }
   0x9   : > { %s1903_s24 = smov (!%p138_p2), 110   ;;  %s1904_s25 = smov (!%p138_p2), 109  }
   0xa   : > { %s1905_s26 = smov (!%p138_p2), 108   ;;  %s1906_s27 = smov (!%p138_p2), 96  }
   0xb   : > { %s2229_s13 = smov (!%p161_p3, %s1667_s13), 1  ;;  %s1907_s28 = smov 95   ;;  %vm262_vm0 = vcmask 1042432   ;;  %v1828_v10 = vld [vmem:[%s2225_s1] sm:$0xff]  ;;  %vm258_vm1 = vcmask 48128   ;;  %vm350_vm2 = vcmask 1031168  }
   0xc   : > { %s1853_s14 = smul.u32 12, %s2229_s13  ;;  %s1908_s4 = smov 94   ;;  %vm255_vm3 = vcmask 1039360   ;;  %v1829_v28 = vld [vmem:[%s2225_s1 + $0x8] sm:$0xff]  ;;  %vm405_vm4 = vcmask 1022976   ;;  %v1831_v36 = vld [vmem:[%s2225_s1 + $0x18] sm:$0xff] }
   0xd   : > { %s1909_s5 = smov 93   ;;  %s1910_s6 = smov 92   ;;  %vm460_vm5 = vcmask 1014784   ;;  %v1830_v44 = vld [vmem:[%s2225_s1 + $0x10] sm:$0xff]  ;;  %vm515_vm6 = vcmask 916480   ;;  %v1833_v52 = vld [vmem:[%s2225_s1 + $0x28] sm:$0xff] }
   0xe   : > { %s165_s17 = scalar_lea.vmem %s2224_s0, %s1853_s14  ;;  %s1911_s7 = smov 80   ;;  %vm570_vm7 = vcmask 908288   ;;  %v1832_v60 = vld [vmem:[%s2225_s1 + $0x20] sm:$0xff]  ;;  %vm625_vm8 = vcmask 900096   ;;  %vm680_vm9 = vcmask 891904   ;;  %vm735_vm10 = vcmask 883712  }
   0xf   : > { %v235_v0 = vld [vmem:[%s165_s17 + $0x8] sm:$0x7]  ;;  %v234_v1 = vld [vmem:[%s165_s17] sm:$0x77]  ;;  %s1912_s8 = smov 79   ;;  %s1913_s11 = smov 78  }
  0x10   : > { %v245_v2 = vunpack.c.l.b16 %v235_v0  ;;  %v243_v3 = vunpack.c.l.b16 %v234_v1  ;;  %v244_v4 = vunpack.c.h.b16 %v234_v1  ;;  %s1914_s16 = smov 77   ;;  %vm790_vm11 = vcmask 785408  }
  0x11   : > { %vm845_vm12 = vcmask 777216   ;;  %vm900_vm13 = vcmask 769024   ;;  %vm955_vm14 = vcmask 760832   ;;  %vm1010_vm15 = vcmask 752640  }
  0x12   : > { %v1956_v5 = vpack.c.b16 %v245_v2, %v245_v2  ;;  %v1958_v6 = vpack.c.b16 %v243_v3, %v243_v3  ;;  %v1960_v7 = vpack.c.b16 %v244_v4, %v244_v4  ;;  %v1835_v4 = vld [vmem:[%s2225_s1 + $0x38] sm:$0xff] }
  0x14   : > { %253 = vrot.lane.b32.xlu1 %v1956_v5, %s1897_s18  ;;  %249 = vrot.lane.b32.xlu0 %v1958_v6, %s1897_s18  ;;  %v306_v8 = vsel %vm262_vm0, %v1958_v6, 0  ;;  %v309_v9 = vsel %vm262_vm0, %v1960_v7, 0 }
  0x15   : > { %346 = vrot.lane.b32.xlu2 %v1960_v7, %s1898_s19  ;;  %318 = vmatpush.bf16.msra.mxu2 %v306_v8 }
  0x16   : > { %332 = vmatpush.bf16.msra.mxu3 %v309_v9 }
  0x18   : > { %1685 = vmatmul.msk.bf16.vlgmr.msra.gmra.mxu2 %vm258_vm1, %v1828_v10 }
  0x19   : > { %1686 = vmatmul.msk.bf16.vlgmr.msra.gmra.mxu3 %vm258_vm1, %v1828_v10 }
  0x1c   : > { %344 = vrot.lane.b32.xlu1 %v1958_v6, %s1898_s19  ;;  %251 = vrot.lane.b32.xlu0 %v1960_v7, %s1897_s18 }
  0x1d   : > { %348 = vrot.lane.b32.xlu2 %v1956_v5, %s1898_s19  ;;  %s1915_s19 = smov 76  }
  0x24   : > { %401 = vrot.lane.b32.xlu1 %v1960_v7, %s1899_s20  ;;  %399 = vrot.lane.b32.xlu0 %v1958_v6, %s1899_s20 }
  0x25   : > { %403 = vrot.lane.b32.xlu2 %v1956_v5, %s1899_s20 }
  0x2c   : > { %456 = vrot.lane.b32.xlu1 %v1960_v7, %s1900_s21  ;;  %454 = vrot.lane.b32.xlu0 %v1958_v6, %s1900_s21 }
  0x2d   : > { %458 = vrot.lane.b32.xlu2 %v1956_v5, %s1900_s21  ;;  %s1827_s21 = sshll.u32 %s2229_s13, 5 }
  0x34   : > { %511 = vrot.lane.b32.xlu1 %v1960_v7, %s1901_s22  ;;  %509 = vrot.lane.b32.xlu0 %v1958_v6, %s1901_s22 }
  0x35   : > { %513 = vrot.lane.b32.xlu2 %v1956_v5, %s1901_s22  ;;  %s1916_s22 = smov 64  }
  0x3c   : > { %566 = vrot.lane.b32.xlu1 %v1960_v7, %s1902_s23  ;;  %564 = vrot.lane.b32.xlu0 %v1958_v6, %s1902_s23 }
  0x3d   : > { %568 = vrot.lane.b32.xlu2 %v1956_v5, %s1902_s23 }
  0x44   : > { %621 = vrot.lane.b32.xlu1 %v1960_v7, %s1903_s24  ;;  %619 = vrot.lane.b32.xlu0 %v1958_v6, %s1903_s24 }
  0x45   : > { %623 = vrot.lane.b32.xlu2 %v1956_v5, %s1903_s24  ;;  %s170_s24 = scalar_lea.vmem %s2227_s3, %s1827_s21 }
  0x4c   : > { %676 = vrot.lane.b32.xlu1 %v1960_v7, %s1904_s25  ;;  %674 = vrot.lane.b32.xlu0 %v1958_v6, %s1904_s25 }
  0x4d   : > { %678 = vrot.lane.b32.xlu2 %v1956_v5, %s1904_s25  ;;  %s1917_s25 = smov 63  }
  0x54   : > { %731 = vrot.lane.b32.xlu1 %v1960_v7, %s1905_s26  ;;  %729 = vrot.lane.b32.xlu0 %v1958_v6, %s1905_s26 }
  0x55   : > { %733 = vrot.lane.b32.xlu2 %v1956_v5, %s1905_s26 }
  0x5c   : > { %786 = vrot.lane.b32.xlu1 %v1960_v7, %s1906_s27  ;;  %784 = vrot.lane.b32.xlu0 %v1958_v6, %s1906_s27 }
  0x5d   : > { %788 = vrot.lane.b32.xlu2 %v1956_v5, %s1906_s27 }
  0x64   : > { %841 = vrot.lane.b32.xlu1 %v1960_v7, %s1907_s28  ;;  %839 = vrot.lane.b32.xlu0 %v1958_v6, %s1907_s28 }
  0x65   : > { %843 = vrot.lane.b32.xlu2 %v1956_v5, %s1907_s28  ;;  %s1918_s28 = smov 62  }
  0x6c   : > { %896 = vrot.lane.b32.xlu1 %v1960_v7, %s1908_s4  ;;  %894 = vrot.lane.b32.xlu0 %v1958_v6, %s1908_s4 }
  0x6d   : > { %898 = vrot.lane.b32.xlu2 %v1956_v5, %s1908_s4  ;;  %s1919_s4 = smov 61  }
  0x6f   : > { %v347_v11 = vpop.permute.xlu2 %346 }
  0x74   : > { %951 = vrot.lane.b32.xlu1 %v1960_v7, %s1909_s5  ;;  %949 = vrot.lane.b32.xlu0 %v1958_v6, %s1909_s5 }
  0x75   : > { %953 = vrot.lane.b32.xlu2 %v1956_v5, %s1909_s5 }
  0x77   : > { %v349_v12 = vpop.permute.xlu2 %348 }
  0x78   : > { %v352_v17 = vsel %vm350_vm2, %v347_v11, %v349_v12 }
  0x79   : > { %v360_v23 = vsel %vm262_vm0, %v352_v17, 0 }
  0x7c   : > { %1006 = vrot.lane.b32.xlu1 %v1960_v7, %s1910_s6  ;;  %1004 = vrot.lane.b32.xlu0 %v1958_v6, %s1910_s6 }
  0x7d   : > { %1008 = vrot.lane.b32.xlu2 %v1956_v5, %s1910_s6 }
  0x7f   : > { %v404_v13 = vpop.permute.xlu2 %403 }
  0x84   : > { %1061 = vrot.lane.b32.xlu1 %v1960_v7, %s1911_s7  ;;  %1059 = vrot.lane.b32.xlu0 %v1958_v6, %s1911_s7 }
  0x85   : > { %1063 = vrot.lane.b32.xlu2 %v1956_v5, %s1911_s7  ;;  %s1920_s7 = smov 60  }
  0x86   : > { %v254_v14 = vpop.permute.xlu1 %253  ;;  %v250_v15 = vpop.permute.xlu0 %249 }
  0x87   : > { %v459_v16 = vpop.permute.xlu2 %458 }
  0x8c   : > { %1116 = vrot.lane.b32.xlu1 %v1960_v7, %s1912_s8  ;;  %1114 = vrot.lane.b32.xlu0 %v1958_v6, %s1912_s8 }
  0x8d   : > { %1118 = vrot.lane.b32.xlu2 %v1956_v5, %s1912_s8 }
  0x8e   : > { %v345_v18 = vpop.permute.xlu1 %344  ;;  %v252_v19 = vpop.permute.xlu0 %251 }
  0x8f   : > { %v256_v20 = vsel %vm255_vm3, %v250_v15, %v252_v19  ;;  %v257_v21 = vsel %vm255_vm3, %v252_v19, %v254_v14  ;;  %v351_v22 = vsel %vm350_vm2, %v345_v18, %v347_v11  ;;  %v514_v24 = vpop.permute.xlu2 %513  ;;  %v1834_v15 = vld [vmem:[%s2225_s1 + $0x30] sm:$0xff]  ;;  %vm1065_vm2 = vcmask 654336  }
  0x90   : > { %v264_v25 = vsel %vm262_vm0, %v256_v20, 0  ;;  %v267_v26 = vsel %vm262_vm0, %v257_v21, 0  ;;  %v357_v27 = vsel %vm262_vm0, %v351_v22, 0  ;;  %vm1120_vm3 = vcmask 646144  }
  0x91   : > { %276 = vmatpush.bf16.msra.mxu0 %v264_v25  ;;  %290 = vmatpush.bf16.msra.mxu1 %v267_v26 }
  0x94   : > { %1679 = vmatmul.msk.bf16.vlgmr.msra.gmra.mxu0 %vm258_vm1, %v1829_v28  ;;  %1680 = vmatmul.msk.bf16.vlgmr.msra.gmra.mxu1 %vm258_vm1, %v1829_v28 }
  0x95   : > { %369 = vmatpush.bf16.msrb.mxu0 %v357_v27  ;;  %383 = vmatpush.bf16.msrb.mxu1 %v360_v23  ;;  %v1837_v23 = vld [vmem:[%s2225_s1 + $0x48] sm:$0xff] }
  0x96   : > { %1171 = vrot.lane.b32.xlu1 %v1960_v7, %s1913_s11  ;;  %1169 = vrot.lane.b32.xlu0 %v1958_v6, %s1913_s11  ;;  %v402_v29 = vpop.permute.xlu1 %401  ;;  %v400_v30 = vpop.permute.xlu0 %399 }
  0x97   : > { %1173 = vrot.lane.b32.xlu2 %v1956_v5, %s1913_s11  ;;  %v406_v31 = vsel %vm405_vm4, %v400_v30, %v402_v29  ;;  %v407_v32 = vsel %vm405_vm4, %v402_v29, %v404_v13  ;;  %v569_v33 = vpop.permute.xlu2 %568  ;;  %vm1175_vm4 = vcmask 637952  }
  0x98   : > { %v412_v34 = vsel %vm262_vm0, %v406_v31, 0  ;;  %v415_v35 = vsel %vm262_vm0, %v407_v32, 0  ;;  %v1836_v31 = vld [vmem:[%s2225_s1 + $0x40] sm:$0xff] }
  0x99   : > { %424 = vmatpush.bf16.msrb.mxu2 %v412_v34  ;;  %438 = vmatpush.bf16.msrb.mxu3 %v415_v35 }
  0x9c   : > { %1697 = vmatmul.msk.bf16.vlgmr.msrb.gmra.mxu2 %vm258_vm1, %v1831_v36  ;;  %1698 = vmatmul.msk.bf16.vlgmr.msrb.gmra.mxu3 %vm258_vm1, %v1831_v36  ;;  %v1839_v36 = vld [vmem:[%s2225_s1 + $0x58] sm:$0xff] }
  0x9e   : > { %1226 = vrot.lane.b32.xlu1 %v1960_v7, %s1914_s16  ;;  %1224 = vrot.lane.b32.xlu0 %v1958_v6, %s1914_s16  ;;  %v457_v37 = vpop.permute.xlu1 %456  ;;  %v455_v38 = vpop.permute.xlu0 %454 }
  0x9f   : > { %1228 = vrot.lane.b32.xlu2 %v1956_v5, %s1914_s16  ;;  %v462_v39 = vsel %vm460_vm5, %v457_v37, %v459_v16  ;;  %v461_v40 = vsel %vm460_vm5, %v455_v38, %v457_v37  ;;  %v624_v41 = vpop.permute.xlu2 %623  ;;  %vm1230_vm5 = vcmask 629760  }
  0xa0   : > { %v470_v42 = vsel %vm262_vm0, %v462_v39, 0  ;;  %v467_v43 = vsel %vm262_vm0, %v461_v40, 0 }
  0xa1   : > { %479 = vmatpush.bf16.msra.mxu0 %v467_v43  ;;  %493 = vmatpush.bf16.msra.mxu1 %v470_v42  ;;  %v1838_v43 = vld [vmem:[%s2225_s1 + $0x50] sm:$0xff] }
  0xa4   : > { %1691 = vmatmul.msk.bf16.vlgmr.msrb.gmra.mxu0 %vm258_vm1, %v1830_v44  ;;  %1692 = vmatmul.msk.bf16.vlgmr.msrb.gmra.mxu1 %vm258_vm1, %v1830_v44 }
  0xa6   : > { %1281 = vrot.lane.b32.xlu1 %v1960_v7, %s1915_s19  ;;  %1279 = vrot.lane.b32.xlu0 %v1958_v6, %s1915_s19  ;;  %v512_v45 = vpop.permute.xlu1 %511  ;;  %v510_v46 = vpop.permute.xlu0 %509 }
  0xa7   : > { %1283 = vrot.lane.b32.xlu2 %v1956_v5, %s1915_s19  ;;  %v517_v47 = vsel %vm515_vm6, %v512_v45, %v514_v24  ;;  %v516_v48 = vsel %vm515_vm6, %v510_v46, %v512_v45  ;;  %v679_v49 = vpop.permute.xlu2 %678  ;;  %vm1285_vm6 = vcmask 621568  }
  0xa8   : > { %v525_v50 = vsel %vm262_vm0, %v517_v47, 0  ;;  %v522_v51 = vsel %vm262_vm0, %v516_v48, 0 }
  0xa9   : > { %534 = vmatpush.bf16.msra.mxu2 %v522_v51  ;;  %548 = vmatpush.bf16.msra.mxu3 %v525_v50  ;;  %v1841_v51 = vld [vmem:[%s2225_s1 + $0x68] sm:$0xff] }
  0xac   : > { %1709 = vmatmul.msk.bf16.vlgmr.msra.gmra.mxu2 %vm258_vm1, %v1833_v52  ;;  %1710 = vmatmul.msk.bf16.vlgmr.msra.gmra.mxu3 %vm258_vm1, %v1833_v52 }
  0xae   : > { %1336 = vrot.lane.b32.xlu1 %v1960_v7, %s1916_s22  ;;  %1334 = vrot.lane.b32.xlu0 %v1958_v6, %s1916_s22  ;;  %v567_v53 = vpop.permute.xlu1 %566  ;;  %v565_v54 = vpop.permute.xlu0 %564 }
  0xaf   : > { %1338 = vrot.lane.b32.xlu2 %v1956_v5, %s1916_s22  ;;  %v572_v55 = vsel %vm570_vm7, %v567_v53, %v569_v33  ;;  %v571_v56 = vsel %vm570_vm7, %v565_v54, %v567_v53  ;;  %v734_v57 = vpop.permute.xlu2 %733  ;;  %vm1340_vm7 = vcmask 523264  }
  0xb0   : > { %v580_v58 = vsel %vm262_vm0, %v572_v55, 0  ;;  %v577_v59 = vsel %vm262_vm0, %v571_v56, 0 }
  0xb1   : > { %589 = vmatpush.bf16.msrb.mxu0 %v577_v59  ;;  %603 = vmatpush.bf16.msrb.mxu1 %v580_v58  ;;  %v1840_v59 = vld [vmem:[%s2225_s1 + $0x60] sm:$0xff] }
  0xb4   : > { %1703 = vmatmul.msk.bf16.vlgmr.msra.gmra.mxu0 %vm258_vm1, %v1832_v60  ;;  %1704 = vmatmul.msk.bf16.vlgmr.msra.gmra.mxu1 %vm258_vm1, %v1832_v60 }
  0xb6   : > { %1391 = vrot.lane.b32.xlu1 %v1960_v7, %s1917_s25  ;;  %1389 = vrot.lane.b32.xlu0 %v1958_v6, %s1917_s25  ;;  %v622_v61 = vpop.permute.xlu1 %621  ;;  %v620_v62 = vpop.permute.xlu0 %619 }
  0xb7   : > { %1393 = vrot.lane.b32.xlu2 %v1956_v5, %s1917_s25  ;;  %v627_v63 = vsel %vm625_vm8, %v622_v61, %v624_v41  ;;  %v626_v0 = vsel %vm625_vm8, %v620_v62, %v622_v61  ;;  %v789_v1 = vpop.permute.xlu2 %788  ;;  %vm1395_vm8 = vcmask 515072  }
  0xb8   : > { %v635_v2 = vsel %vm262_vm0, %v627_v63, 0  ;;  %v632_v3 = vsel %vm262_vm0, %v626_v0, 0 }
  0xb9   : > { %644 = vmatpush.bf16.msrb.mxu2 %v632_v3  ;;  %658 = vmatpush.bf16.msrb.mxu3 %v635_v2  ;;  %v1843_v3 = vld [vmem:[%s2225_s1 + $0x78] sm:$0xff] }
  0xbc   : > { %1721 = vmatmul.msk.bf16.vlgmr.msrb.gmra.mxu2 %vm258_vm1, %v1835_v4  ;;  %1722 = vmatmul.msk.bf16.vlgmr.msrb.gmra.mxu3 %vm258_vm1, %v1835_v4 }
  0xbe   : > { %1446 = vrot.lane.b32.xlu1 %v1960_v7, %s1918_s28  ;;  %1444 = vrot.lane.b32.xlu0 %v1958_v6, %s1918_s28  ;;  %v677_v8 = vpop.permute.xlu1 %676  ;;  %v675_v9 = vpop.permute.xlu0 %674 }
  0xbf   : > { %1448 = vrot.lane.b32.xlu2 %v1956_v5, %s1918_s28  ;;  %v682_v10 = vsel %vm680_vm9, %v677_v8, %v679_v49  ;;  %v681_v11 = vsel %vm680_vm9, %v675_v9, %v677_v8  ;;  %v844_v12 = vpop.permute.xlu2 %843  ;;  %vm1450_vm9 = vcmask 506880  }
  0xc0   : > { %v690_v13 = vsel %vm262_vm0, %v682_v10, 0  ;;  %v687_v14 = vsel %vm262_vm0, %v681_v11, 0 }
  0xc1   : > { %699 = vmatpush.bf16.msra.mxu0 %v687_v14  ;;  %713 = vmatpush.bf16.msra.mxu1 %v690_v13  ;;  %v1842_v13 = vld [vmem:[%s2225_s1 + $0x70] sm:$0xff] }
  0xc4   : > { %1715 = vmatmul.msk.bf16.vlgmr.msrb.gmra.mxu0 %vm258_vm1, %v1834_v15  ;;  %1716 = vmatmul.msk.bf16.vlgmr.msrb.gmra.mxu1 %vm258_vm1, %v1834_v15 }
  0xc6   : > { %1501 = vrot.lane.b32.xlu1 %v1960_v7, %s1919_s4  ;;  %1499 = vrot.lane.b32.xlu0 %v1958_v6, %s1919_s4  ;;  %v732_v16 = vpop.permute.xlu1 %731  ;;  %v730_v17 = vpop.permute.xlu0 %729 }
  0xc7   : > { %1503 = vrot.lane.b32.xlu2 %v1956_v5, %s1919_s4  ;;  %v737_v18 = vsel %vm735_vm10, %v732_v16, %v734_v57  ;;  %v736_v19 = vsel %vm735_vm10, %v730_v17, %v732_v16  ;;  %v899_v20 = vpop.permute.xlu2 %898  ;;  %vm1505_vm10 = vcmask 498688  }
  0xc8   : > { %v745_v21 = vsel %vm262_vm0, %v737_v18, 0  ;;  %v742_v22 = vsel %vm262_vm0, %v736_v19, 0 }
  0xc9   : > { %754 = vmatpush.bf16.msra.mxu2 %v742_v22  ;;  %768 = vmatpush.bf16.msra.mxu3 %v745_v21  ;;  %v1845_v21 = vld [vmem:[%s2225_s1 + $0x88] sm:$0xff] }
  0xcc   : > { %1733 = vmatmul.msk.bf16.vlgmr.msra.gmra.mxu2 %vm258_vm1, %v1837_v23  ;;  %1734 = vmatmul.msk.bf16.vlgmr.msra.gmra.mxu3 %vm258_vm1, %v1837_v23  ;;  %v334_v23 = vpop.f32.mrf.mxu3 }
  0xce   : > { %1556 = vrot.lane.b32.xlu1 %v1960_v7, %s1920_s7  ;;  %1554 = vrot.lane.b32.xlu0 %v1958_v6, %s1920_s7  ;;  %v787_v24 = vpop.permute.xlu1 %786  ;;  %v785_v25 = vpop.permute.xlu0 %784 }
  0xcf   : > { %1558 = vrot.lane.b32.xlu2 %v1956_v5, %s1920_s7  ;;  %v792_v26 = vsel %vm790_vm11, %v787_v24, %v789_v1  ;;  %v791_v27 = vsel %vm790_vm11, %v785_v25, %v787_v24  ;;  %v954_v28 = vpop.permute.xlu2 %953  ;;  %v320_v24 = vpop.f32.mrf.mxu2  ;;  %vm1560_vm11 = vcmask 490496  }
  0xd0   : > { %v800_v29 = vsel %vm262_vm0, %v792_v26, 0  ;;  %v797_v30 = vsel %vm262_vm0, %v791_v27, 0 }
  0xd1   : > { %809 = vmatpush.bf16.msrb.mxu0 %v797_v30  ;;  %823 = vmatpush.bf16.msrb.mxu1 %v800_v29  ;;  %v1844_v29 = vld [vmem:[%s2225_s1 + $0x80] sm:$0xff] }
  0xd4   : > { %1727 = vmatmul.msk.bf16.vlgmr.msra.gmra.mxu0 %vm258_vm1, %v1836_v31  ;;  %1728 = vmatmul.msk.bf16.vlgmr.msra.gmra.mxu1 %vm258_vm1, %v1836_v31 }
  0xd6   : > { %v842_v6 = vpop.permute.xlu1 %841  ;;  %v840_v5 = vpop.permute.xlu0 %839 }
  0xd7   : > { %v847_v7 = vsel %vm845_vm12, %v842_v6, %v844_v12  ;;  %v846_v32 = vsel %vm845_vm12, %v840_v5, %v842_v6  ;;  %v1009_v33 = vpop.permute.xlu2 %1008 }
  0xd8   : > { %v855_v34 = vsel %vm262_vm0, %v847_v7, 0  ;;  %v852_v35 = vsel %vm262_vm0, %v846_v32, 0 }
  0xd9   : > { %864 = vmatpush.bf16.msrb.mxu2 %v852_v35  ;;  %878 = vmatpush.bf16.msrb.mxu3 %v855_v34  ;;  %v336_v34 = vpop.f32.mrf.mxu3  ;;  %v322_v35 = vpop.f32.mrf.mxu2 }
  0xdc   : > { %1745 = vmatmul.msk.bf16.vlgmr.msrb.gmra.mxu2 %vm258_vm1, %v1839_v36  ;;  %1746 = vmatmul.msk.bf16.vlgmr.msrb.gmra.mxu3 %vm258_vm1, %v1839_v36 }
  0xde   : > { %v897_v37 = vpop.permute.xlu1 %896  ;;  %v895_v38 = vpop.permute.xlu0 %894 }
  0xdf   : > { %v902_v39 = vsel %vm900_vm13, %v897_v37, %v899_v20  ;;  %v901_v40 = vsel %vm900_vm13, %v895_v38, %v897_v37  ;;  %v1064_v44 = vpop.permute.xlu2 %1063 }
  0xe0   : > { %v910_v41 = vsel %vm262_vm0, %v902_v39, 0  ;;  %v907_v42 = vsel %vm262_vm0, %v901_v40, 0 }
  0xe1   : > { %919 = vmatpush.bf16.msra.mxu0 %v907_v42  ;;  %933 = vmatpush.bf16.msra.mxu1 %v910_v41 }
  0xe4   : > { %1739 = vmatmul.msk.bf16.vlgmr.msrb.gmra.mxu0 %vm258_vm1, %v1838_v43  ;;  %1740 = vmatmul.msk.bf16.vlgmr.msrb.gmra.mxu1 %vm258_vm1, %v1838_v43 }
  0xe6   : > { %v952_v45 = vpop.permute.xlu1 %951  ;;  %v950_v46 = vpop.permute.xlu0 %949 }
  0xe7   : > { %v957_v47 = vsel %vm955_vm14, %v952_v45, %v954_v28  ;;  %v956_v48 = vsel %vm955_vm14, %v950_v46, %v952_v45  ;;  %v1119_v52 = vpop.permute.xlu2 %1118 }
  0xe8   : > { %v965_v49 = vsel %vm262_vm0, %v957_v47, 0  ;;  %v962_v50 = vsel %vm262_vm0, %v956_v48, 0 }
  0xe9   : > { %974 = vmatpush.bf16.msra.mxu2 %v962_v50  ;;  %988 = vmatpush.bf16.msra.mxu3 %v965_v49 }
  0xec   : > { %1757 = vmatmul.msk.bf16.vlgmr.msra.gmra.mxu2 %vm258_vm1, %v1841_v51  ;;  %1758 = vmatmul.msk.bf16.vlgmr.msra.gmra.mxu3 %vm258_vm1, %v1841_v51 }
  0xee   : > { %v1007_v53 = vpop.permute.xlu1 %1006  ;;  %v1005_v54 = vpop.permute.xlu0 %1004 }
  0xef   : > { %v1012_v55 = vsel %vm1010_vm15, %v1007_v53, %v1009_v33  ;;  %v1011_v56 = vsel %vm1010_vm15, %v1005_v54, %v1007_v53  ;;  %v1846_v54 = vld [vmem:[%s2225_s1 + $0x90] sm:$0xff] }
  0xf0   : > { %v1020_v57 = vsel %vm262_vm0, %v1012_v55, 0  ;;  %v1017_v58 = vsel %vm262_vm0, %v1011_v56, 0 }
  0xf1   : > { %1029 = vmatpush.bf16.msrb.mxu0 %v1017_v58  ;;  %1043 = vmatpush.bf16.msrb.mxu1 %v1020_v57  ;;  %v1174_v60 = vpop.permute.xlu2 %1173 }
  0xf4   : > { %1751 = vmatmul.msk.bf16.vlgmr.msra.gmra.mxu0 %vm258_vm1, %v1840_v59  ;;  %1752 = vmatmul.msk.bf16.vlgmr.msra.gmra.mxu1 %vm258_vm1, %v1840_v59 }
  0xf6   : > { %v1062_v61 = vpop.permute.xlu1 %1061  ;;  %v1060_v62 = vpop.permute.xlu0 %1059 }
  0xf7   : > { %v1067_v63 = vsel %vm1065_vm2, %v1062_v61, %v1064_v44  ;;  %v1066_v0 = vsel %vm1065_vm2, %v1060_v62, %v1062_v61  ;;  %v1847_v44 = vld [vmem:[%s2225_s1 + $0x98] sm:$0xff] }
  0xf8   : > { %v1075_v1 = vsel %vm262_vm0, %v1067_v63, 0  ;;  %v1072_v2 = vsel %vm262_vm0, %v1066_v0, 0 }
  0xf9   : > { %1084 = vmatpush.bf16.msrb.mxu2 %v1072_v2  ;;  %1098 = vmatpush.bf16.msrb.mxu3 %v1075_v1  ;;  %v1229_v14 = vpop.permute.xlu2 %1228 }
  0xfc   : > { %1769 = vmatmul.msk.bf16.vlgmr.msrb.gmra.mxu2 %vm258_vm1, %v1843_v3  ;;  %1770 = vmatmul.msk.bf16.vlgmr.msrb.gmra.mxu3 %vm258_vm1, %v1843_v3 }
  0xfe   : > { %v1117_v4 = vpop.permute.xlu1 %1116  ;;  %v1115_v8 = vpop.permute.xlu0 %1114 }
  0xff   : > { %v1122_v9 = vsel %vm1120_vm3, %v1117_v4, %v1119_v52  ;;  %v1121_v10 = vsel %vm1120_vm3, %v1115_v8, %v1117_v4 }
 0x100   : > { %v1130_v11 = vsel %vm262_vm0, %v1122_v9, 0  ;;  %v1127_v12 = vsel %vm262_vm0, %v1121_v10, 0 }
 0x101   : > { %1139 = vmatpush.bf16.msra.mxu0 %v1127_v12  ;;  %1153 = vmatpush.bf16.msra.mxu1 %v1130_v11  ;;  %v1284_v22 = vpop.permute.xlu2 %1283  ;;  %v1849_v12 = vld [vmem:[%s2225_s1 + $0xa8] sm:$0xff] }
 0x104   : > { %1763 = vmatmul.msk.bf16.vlgmr.msrb.gmra.mxu0 %vm258_vm1, %v1842_v13  ;;  %1764 = vmatmul.msk.bf16.vlgmr.msrb.gmra.mxu1 %vm258_vm1, %v1842_v13 }
 0x108   : > { %v1172_v15 = vpop.permute.xlu1 %1171  ;;  %v1170_v16 = vpop.permute.xlu0 %1169 }
 0x109   : > { %v1177_v17 = vsel %vm1175_vm4, %v1172_v15, %v1174_v60  ;;  %v1176_v18 = vsel %vm1175_vm4, %v1170_v16, %v1172_v15  ;;  %v1339_v33 = vpop.permute.xlu2 %1338 }
 0x10a   : > { %v1185_v19 = vsel %vm262_vm0, %v1177_v17, 0  ;;  %v1182_v20 = vsel %vm262_vm0, %v1176_v18, 0 }
 0x10b   : > { %1194 = vmatpush.bf16.msra.mxu2 %v1182_v20  ;;  %1208 = vmatpush.bf16.msra.mxu3 %v1185_v19 }
 0x10e   : > { %1781 = vmatmul.msk.bf16.vlgmr.msra.gmra.mxu2 %vm258_vm1, %v1845_v21  ;;  %1782 = vmatmul.msk.bf16.vlgmr.msra.gmra.mxu3 %vm258_vm1, %v1845_v21 }
 0x110   : > { %v1227_v25 = vpop.permute.xlu1 %1226  ;;  %v1225_v26 = vpop.permute.xlu0 %1224 }
 0x111   : > { %v1232_v27 = vsel %vm1230_vm5, %v1227_v25, %v1229_v14  ;;  %v1231_v28 = vsel %vm1230_vm5, %v1225_v26, %v1227_v25  ;;  %v278_v31 = vpop.f32.mrf.mxu0  ;;  %v292_v6 = vpop.f32.mrf.mxu1 }
 0x112   : > { %v1240_v30 = vsel %vm262_vm0, %v1232_v27, 0  ;;  %v1237_v5 = vsel %vm262_vm0, %v1231_v28, 0  ;;  %v335_v7 = vadd.f32 %v334_v23, %v292_v6  ;;  %v321_v32 = vadd.f32 %v320_v24, %v278_v31  ;;  %v1394_v47 = vpop.permute.xlu2 %1393  ;;  %v1848_v24 = vld [vmem:[%s2225_s1 + $0xa0] sm:$0xff] }
 0x113   : > { %1249 = vmatpush.bf16.msrb.mxu0 %v1237_v5  ;;  %1263 = vmatpush.bf16.msrb.mxu1 %v1240_v30 }
 0x114   : > { %1775 = vmatmul.msk.bf16.vlgmr.msra.gmra.mxu0 %vm258_vm1, %v1844_v29  ;;  %1776 = vmatmul.msk.bf16.vlgmr.msra.gmra.mxu1 %vm258_vm1, %v1844_v29 }
 0x118   : > { %v1282_v36 = vpop.permute.xlu1 %1281  ;;  %v1280_v37 = vpop.permute.xlu0 %1279 }
 0x119   : > { %v1287_v38 = vsel %vm1285_vm6, %v1282_v36, %v1284_v22  ;;  %v1286_v39 = vsel %vm1285_vm6, %v1280_v37, %v1282_v36  ;;  %v280_v41 = vpop.f32.mrf.mxu0  ;;  %v294_v42 = vpop.f32.mrf.mxu1 }
 0x11a   : > { %v1295_v40 = vsel %vm262_vm0, %v1287_v38, 0  ;;  %v1292_v43 = vsel %vm262_vm0, %v1286_v39, 0  ;;  %v337_v45 = vadd.f32 %v336_v34, %v294_v42  ;;  %v323_v46 = vadd.f32 %v322_v35, %v280_v41  ;;  %v1449_v15 = vpop.permute.xlu2 %1448  ;;  %v1851_v41 = vld [vmem:[%s2225_s1 + $0xb8] sm:$0xff] }
 0x11b   : > { %1304 = vmatpush.bf16.msrb.mxu2 %v1292_v43  ;;  %1318 = vmatpush.bf16.msrb.mxu3 %v1295_v40 }
 0x11e   : > { %1793 = vmatmul.msk.bf16.vlgmr.msrb.gmra.mxu2 %vm258_vm1, %v1847_v44  ;;  %1794 = vmatmul.msk.bf16.vlgmr.msrb.gmra.mxu3 %vm258_vm1, %v1847_v44 }
 0x11f   : > { %v426_v52 = vpop.f32.mrf.mxu2  ;;  %v440_v53 = vpop.f32.mrf.mxu3 }
 0x120   : > { %v1337_v48 = vpop.permute.xlu1 %1336  ;;  %v1335_v49 = vpop.permute.xlu0 %1334 }
 0x121   : > { %v1342_v50 = vsel %vm1340_vm7, %v1337_v48, %v1339_v33  ;;  %v1341_v51 = vsel %vm1340_vm7, %v1335_v49, %v1337_v48  ;;  %v371_v56 = vpop.f32.mrf.mxu0  ;;  %v385_v57 = vpop.f32.mrf.mxu1  ;;  %v1921_v48 = vmov 0  }
 0x122   : > { %v1350_v55 = vsel %vm262_vm0, %v1342_v50, 0  ;;  %v1347_v58 = vsel %vm262_vm0, %v1341_v51, 0  ;;  %v390_v59 = vadd.f32 %v371_v56, %v321_v32  ;;  %v391_v60 = vadd.f32 %v385_v57, %v335_v7  ;;  %v1504_v5 = vpop.permute.xlu2 %1503  ;;  %1887 = vset.pattern.permute.xlu0 %v1921_v48  ;;  %1888 = vset.pattern.permute.xlu1 %v1921_v48 }
 0x123   : > { %1359 = vmatpush.bf16.msra.mxu0 %v1347_v58  ;;  %1373 = vmatpush.bf16.msra.mxu1 %v1350_v55  ;;  %v1850_v55 = vld [vmem:[%s2225_s1 + $0xb0] sm:$0xff] }
 0x124   : > { %v445_v61 = vadd.f32 %v426_v52, %v390_v59  ;;  %v446_v62 = vadd.f32 %v440_v53, %v391_v60  ;;  %1787 = vmatmul.msk.bf16.vlgmr.msrb.gmra.mxu0 %vm258_vm1, %v1846_v54  ;;  %1788 = vmatmul.msk.bf16.vlgmr.msrb.gmra.mxu1 %vm258_vm1, %v1846_v54 }
 0x127   : > { %v428_v3 = vpop.f32.mrf.mxu2  ;;  %v442_v4 = vpop.f32.mrf.mxu3 }
 0x128   : > { %v1392_v63 = vpop.permute.xlu1 %1391  ;;  %v1390_v0 = vpop.permute.xlu0 %1389 }
 0x129   : > { %v1397_v1 = vsel %vm1395_vm8, %v1392_v63, %v1394_v47  ;;  %v1396_v2 = vsel %vm1395_vm8, %v1390_v0, %v1392_v63  ;;  %v373_v9 = vpop.f32.mrf.mxu0  ;;  %v387_v10 = vpop.f32.mrf.mxu1  ;;  %v223_v0 = vld [vmem:[%s2226_s2 + $0x8] sm:$0xff] }
 0x12a   : > { %v1405_v8 = vsel %vm262_vm0, %v1397_v1, 0  ;;  %v1402_v11 = vsel %vm262_vm0, %v1396_v2, 0  ;;  %v392_v13 = vadd.f32 %v373_v9, %v323_v46  ;;  %v393_v14 = vadd.f32 %v387_v10, %v337_v45  ;;  %v222_v46 = vld [vmem:[%s2226_s2] sm:$0xff]  ;;  %v1559_v47 = vpop.permute.xlu2 %1558  ;;  %231 = vperm.xlu1 %1888, %v223_v0  }
 0x12b   : > { %1414 = vmatpush.bf16.msra.mxu2 %v1402_v11  ;;  %1428 = vmatpush.bf16.msra.mxu3 %v1405_v8 }
 0x12c   : > { %v447_v16 = vadd.f32 %v428_v3, %v392_v13  ;;  %v448_v17 = vadd.f32 %v442_v4, %v393_v14  ;;  %226 = vperm.xlu0 %1887, %v222_v46   ;;  %v1852_v14 = vld [vmem:[%s2225_s1 + $0xc0] sm:$0xff] }
 0x12e   : > { %1805 = vmatmul.msk.bf16.vlgmr.msra.gmra.mxu2 %vm258_vm1, %v1849_v12  ;;  %1806 = vmatmul.msk.bf16.vlgmr.msra.gmra.mxu3 %vm258_vm1, %v1849_v12 }
 0x12f   : > { %v536_v22 = vpop.f32.mrf.mxu2  ;;  %v550_v23 = vpop.f32.mrf.mxu3 }
 0x130   : > { %v1447_v18 = vpop.permute.xlu1 %1446  ;;  %v1445_v19 = vpop.permute.xlu0 %1444 }
 0x131   : > { %v1452_v20 = vsel %vm1450_vm9, %v1447_v18, %v1449_v15  ;;  %v1451_v21 = vsel %vm1450_vm9, %v1445_v19, %v1447_v18  ;;  %v481_v26 = vpop.f32.mrf.mxu0  ;;  %v495_v27 = vpop.f32.mrf.mxu1 }
 0x132   : > { %v1460_v25 = vsel %vm262_vm0, %v1452_v20, 0  ;;  %v1457_v28 = vsel %vm262_vm0, %v1451_v21, 0  ;;  %v500_v29 = vadd.f32 %v481_v26, %v445_v61  ;;  %v501_v30 = vadd.f32 %v495_v27, %v446_v62 }
 0x133   : > { %1469 = vmatpush.bf16.msrb.mxu0 %v1457_v28  ;;  %1483 = vmatpush.bf16.msrb.mxu1 %v1460_v25 }
 0x134   : > { %v555_v31 = vadd.f32 %v536_v22, %v500_v29  ;;  %v556_v6 = vadd.f32 %v550_v23, %v501_v30  ;;  %1799 = vmatmul.msk.bf16.vlgmr.msra.gmra.mxu0 %vm258_vm1, %v1848_v24  ;;  %1800 = vmatmul.msk.bf16.vlgmr.msra.gmra.mxu1 %vm258_vm1, %v1848_v24 }
 0x137   : > { %v538_v35 = vpop.f32.mrf.mxu2  ;;  %v552_v36 = vpop.f32.mrf.mxu3 }
 0x138   : > { %v1502_v7 = vpop.permute.xlu1 %1501  ;;  %v1500_v32 = vpop.permute.xlu0 %1499 }
 0x139   : > { %v1507_v33 = vsel %vm1505_vm10, %v1502_v7, %v1504_v5  ;;  %v1506_v34 = vsel %vm1505_vm10, %v1500_v32, %v1502_v7  ;;  %v483_v38 = vpop.f32.mrf.mxu0  ;;  %v497_v39 = vpop.f32.mrf.mxu1 }
 0x13a   : > { %v1515_v37 = vsel %vm262_vm0, %v1507_v33, 0  ;;  %v1512_v40 = vsel %vm262_vm0, %v1506_v34, 0  ;;  %v502_v42 = vadd.f32 %v483_v38, %v447_v16  ;;  %v503_v43 = vadd.f32 %v497_v39, %v448_v17 }
 0x13b   : > { %1524 = vmatpush.bf16.msrb.mxu2 %v1512_v40  ;;  %1538 = vmatpush.bf16.msrb.mxu3 %v1515_v37 }
 0x13c   : > { %v557_v44 = vadd.f32 %v538_v35, %v502_v42  ;;  %v558_v45 = vadd.f32 %v552_v36, %v503_v43 }
 0x13e   : > { %1817 = vmatmul.msk.bf16.vlgmr.msrb.gmra.mxu2 %vm258_vm1, %v1851_v41  ;;  %1818 = vmatmul.msk.bf16.vlgmr.msrb.gmra.mxu3 %vm258_vm1, %v1851_v41 }
 0x13f   : > { %v646_v53 = vpop.f32.mrf.mxu2  ;;  %v660_v54 = vpop.f32.mrf.mxu3 }
 0x140   : > { %v1557_v49 = vpop.permute.xlu1 %1556  ;;  %v1555_v50 = vpop.permute.xlu0 %1554 }
 0x141   : > { %v1562_v51 = vsel %vm1560_vm11, %v1557_v49, %v1559_v47  ;;  %v1561_v52 = vsel %vm1560_vm11, %v1555_v50, %v1557_v49  ;;  %v591_v57 = vpop.f32.mrf.mxu0  ;;  %v605_v58 = vpop.f32.mrf.mxu1 }
 0x142   : > { %v1570_v56 = vsel %vm262_vm0, %v1562_v51, 0  ;;  %v1567_v59 = vsel %vm262_vm0, %v1561_v52, 0  ;;  %v610_v60 = vadd.f32 %v591_v57, %v555_v31  ;;  %v611_v61 = vadd.f32 %v605_v58, %v556_v6 }
 0x143   : > { %1579 = vmatpush.bf16.msra.mxu0 %v1567_v59  ;;  %1593 = vmatpush.bf16.msra.mxu1 %v1570_v56 }
 0x144   : > { %v665_v62 = vadd.f32 %v646_v53, %v610_v60  ;;  %v666_v63 = vadd.f32 %v660_v54, %v611_v61  ;;  %1811 = vmatmul.msk.bf16.vlgmr.msrb.gmra.mxu0 %vm258_vm1, %v1850_v55  ;;  %1812 = vmatmul.msk.bf16.vlgmr.msrb.gmra.mxu1 %vm258_vm1, %v1850_v55 }
 0x147   : > { %v648_v1 = vpop.f32.mrf.mxu2  ;;  %v662_v2 = vpop.f32.mrf.mxu3 }
 0x149   : > { %v593_v3 = vpop.f32.mrf.mxu0  ;;  %v607_v4 = vpop.f32.mrf.mxu1 }
 0x14a   : > { %v612_v8 = vadd.f32 %v593_v3, %v557_v44  ;;  %v613_v9 = vadd.f32 %v607_v4, %v558_v45 }
 0x14c   : > { %v667_v10 = vadd.f32 %v648_v1, %v612_v8  ;;  %v668_v11 = vadd.f32 %v662_v2, %v613_v9 }
 0x14f   : > { %v756_v12 = vpop.f32.mrf.mxu2  ;;  %v770_v13 = vpop.f32.mrf.mxu3 }
 0x151   : > { %v701_v15 = vpop.f32.mrf.mxu0  ;;  %v715_v16 = vpop.f32.mrf.mxu1 }
 0x152   : > { %v720_v17 = vadd.f32 %v701_v15, %v665_v62  ;;  %v721_v18 = vadd.f32 %v715_v16, %v666_v63 }
 0x154   : > { %v775_v19 = vadd.f32 %v756_v12, %v720_v17  ;;  %v776_v20 = vadd.f32 %v770_v13, %v721_v18  ;;  %1823 = vmatmul.msk.bf16.vlgmr.msra.gmra.mxu0 %vm258_vm1, %v1852_v14  ;;  %1824 = vmatmul.msk.bf16.vlgmr.msra.gmra.mxu1 %vm258_vm1, %v1852_v14 }
 0x157   : > { %v758_v21 = vpop.f32.mrf.mxu2  ;;  %v772_v22 = vpop.f32.mrf.mxu3 }
 0x159   : > { %v703_v23 = vpop.f32.mrf.mxu0  ;;  %v717_v24 = vpop.f32.mrf.mxu1 }
 0x15a   : > { %v722_v25 = vadd.f32 %v703_v23, %v667_v10  ;;  %v723_v26 = vadd.f32 %v717_v24, %v668_v11 }
 0x15c   : > { %v777_v27 = vadd.f32 %v758_v21, %v722_v25  ;;  %v778_v28 = vadd.f32 %v772_v22, %v723_v26 }
 0x15f   : > { %v866_v29 = vpop.f32.mrf.mxu2  ;;  %v880_v30 = vpop.f32.mrf.mxu3 }
 0x161   : > { %v811_v31 = vpop.f32.mrf.mxu0  ;;  %v825_v6 = vpop.f32.mrf.mxu1 }
 0x162   : > { %v830_v5 = vadd.f32 %v811_v31, %v775_v19  ;;  %v831_v7 = vadd.f32 %v825_v6, %v776_v20 }
 0x164   : > { %v885_v32 = vadd.f32 %v866_v29, %v830_v5  ;;  %v886_v33 = vadd.f32 %v880_v30, %v831_v7 }
 0x167   : > { %v868_v34 = vpop.f32.mrf.mxu2  ;;  %v882_v35 = vpop.f32.mrf.mxu3 }
 0x169   : > { %v813_v36 = vpop.f32.mrf.mxu0  ;;  %v827_v37 = vpop.f32.mrf.mxu1 }
 0x16a   : > { %v832_v38 = vadd.f32 %v813_v36, %v777_v27  ;;  %v833_v39 = vadd.f32 %v827_v37, %v778_v28 }
 0x16c   : > { %v887_v40 = vadd.f32 %v868_v34, %v832_v38  ;;  %v888_v41 = vadd.f32 %v882_v35, %v833_v39 }
 0x16f   : > { %v976_v42 = vpop.f32.mrf.mxu2  ;;  %v990_v43 = vpop.f32.mrf.mxu3 }
 0x171   : > { %v921_v44 = vpop.f32.mrf.mxu0  ;;  %v935_v45 = vpop.f32.mrf.mxu1 }
 0x172   : > { %v940_v46 = vadd.f32 %v921_v44, %v885_v32  ;;  %v941_v47 = vadd.f32 %v935_v45, %v886_v33 }
 0x174   : > { %v995_v19 = vadd.f32 %v976_v42, %v940_v46  ;;  %v996_v20 = vadd.f32 %v990_v43, %v941_v47 }
 0x177   : > { %v978_v48 = vpop.f32.mrf.mxu2  ;;  %v992_v49 = vpop.f32.mrf.mxu3 }
 0x179   : > { %v923_v50 = vpop.f32.mrf.mxu0  ;;  %v937_v51 = vpop.f32.mrf.mxu1 }
 0x17a   : > { %v942_v52 = vadd.f32 %v923_v50, %v887_v40  ;;  %v943_v53 = vadd.f32 %v937_v51, %v888_v41 }
 0x17c   : > { %v997_v29 = vadd.f32 %v978_v48, %v942_v52  ;;  %v998_v30 = vadd.f32 %v992_v49, %v943_v53 }
 0x17f   : > { %v1086_v54 = vpop.f32.mrf.mxu2  ;;  %v1100_v55 = vpop.f32.mrf.mxu3 }
 0x181   : > { %v1031_v56 = vpop.f32.mrf.mxu0  ;;  %v1045_v57 = vpop.f32.mrf.mxu1 }
 0x182   : > { %v1050_v21 = vadd.f32 %v1031_v56, %v995_v19  ;;  %v1051_v22 = vadd.f32 %v1045_v57, %v996_v20 }
 0x184   : > { %v1105_v25 = vadd.f32 %v1086_v54, %v1050_v21  ;;  %v1106_v26 = vadd.f32 %v1100_v55, %v1051_v22 }
 0x187   : > { %v1088_v58 = vpop.f32.mrf.mxu2  ;;  %v1102_v59 = vpop.f32.mrf.mxu3 }
 0x189   : > { %v1033_v60 = vpop.f32.mrf.mxu0  ;;  %v1047_v61 = vpop.f32.mrf.mxu1 }
 0x18a   : > { %v1052_v5 = vadd.f32 %v1033_v60, %v997_v29  ;;  %v1053_v7 = vadd.f32 %v1047_v61, %v998_v30 }
 0x18c   : > { %v1107_v34 = vadd.f32 %v1088_v58, %v1052_v5  ;;  %v1108_v35 = vadd.f32 %v1102_v59, %v1053_v7 }
 0x191   : > { %v1196_v62 = vpop.f32.mrf.mxu2  ;;  %v1210_v63 = vpop.f32.mrf.mxu3 }
 0x192   : > { %v1141_v0 = vpop.f32.mrf.mxu0  ;;  %v1155_v1 = vpop.f32.mrf.mxu1 }
 0x193   : > { %v1160_v31 = vadd.f32 %v1141_v0, %v1105_v25  ;;  %v1161_v6 = vadd.f32 %v1155_v1, %v1106_v26 }
 0x195   : > { %v1215_v32 = vadd.f32 %v1196_v62, %v1160_v31  ;;  %v1216_v33 = vadd.f32 %v1210_v63, %v1161_v6 }
 0x199   : > { %v1198_v2 = vpop.f32.mrf.mxu2  ;;  %v1212_v3 = vpop.f32.mrf.mxu3 }
 0x19a   : > { %v1143_v4 = vpop.f32.mrf.mxu0  ;;  %v1157_v8 = vpop.f32.mrf.mxu1 }
 0x19b   : > { %v1162_v42 = vadd.f32 %v1143_v4, %v1107_v34  ;;  %v1163_v43 = vadd.f32 %v1157_v8, %v1108_v35 }
 0x19c   : > { %v232_v20 = vpop.permute.xlu1 %231 }
 0x19d   : > { %v1217_v46 = vadd.f32 %v1198_v2, %v1162_v42  ;;  %v1218_v47 = vadd.f32 %v1212_v3, %v1163_v43 }
 0x19e   : > { %v227_v2 = vpop.permute.xlu0 %226 }
 0x1a1   : > { %v1306_v11 = vpop.f32.mrf.mxu2  ;;  %v1320_v12 = vpop.f32.mrf.mxu3 }
 0x1a2   : > { %v1251_v9 = vpop.f32.mrf.mxu0  ;;  %v1265_v10 = vpop.f32.mrf.mxu1 }
 0x1a3   : > { %v1270_v36 = vadd.f32 %v1251_v9, %v1215_v32  ;;  %v1271_v37 = vadd.f32 %v1265_v10, %v1216_v33 }
 0x1a5   : > { %v1325_v44 = vadd.f32 %v1306_v11, %v1270_v36  ;;  %v1326_v45 = vadd.f32 %v1320_v12, %v1271_v37 }
 0x1a9   : > { %v1308_v15 = vpop.f32.mrf.mxu2  ;;  %v1322_v16 = vpop.f32.mrf.mxu3 }
 0x1aa   : > { %v1253_v13 = vpop.f32.mrf.mxu0  ;;  %v1267_v14 = vpop.f32.mrf.mxu1 }
 0x1ab   : > { %v1272_v50 = vadd.f32 %v1253_v13, %v1217_v46  ;;  %v1273_v51 = vadd.f32 %v1267_v14, %v1218_v47 }
 0x1ad   : > { %v1327_v58 = vadd.f32 %v1308_v15, %v1272_v50  ;;  %v1328_v59 = vadd.f32 %v1322_v16, %v1273_v51 }
 0x1b1   : > { %v1416_v23 = vpop.f32.mrf.mxu2  ;;  %v1430_v24 = vpop.f32.mrf.mxu3 }
 0x1b2   : > { %v1361_v17 = vpop.f32.mrf.mxu0  ;;  %v1375_v18 = vpop.f32.mrf.mxu1 }
 0x1b3   : > { %v1380_v48 = vadd.f32 %v1361_v17, %v1325_v44  ;;  %v1381_v49 = vadd.f32 %v1375_v18, %v1326_v45 }
 0x1b5   : > { %v1435_v54 = vadd.f32 %v1416_v23, %v1380_v48  ;;  %v1436_v55 = vadd.f32 %v1430_v24, %v1381_v49 }
 0x1b9   : > { %v1418_v38 = vpop.f32.mrf.mxu2  ;;  %v1432_v39 = vpop.f32.mrf.mxu3 }
 0x1ba   : > { %v1363_v27 = vpop.f32.mrf.mxu0  ;;  %v1377_v28 = vpop.f32.mrf.mxu1 }
 0x1bb   : > { %v1382_v62 = vadd.f32 %v1363_v27, %v1327_v58  ;;  %v1383_v63 = vadd.f32 %v1377_v28, %v1328_v59 }
 0x1bd   : > { %v1437_v8 = vadd.f32 %v1418_v38, %v1382_v62  ;;  %v1438_v9 = vadd.f32 %v1432_v39, %v1383_v63 }
 0x1c1   : > { %v1526_v56 = vpop.f32.mrf.mxu2  ;;  %v1540_v57 = vpop.f32.mrf.mxu3 }
 0x1c2   : > { %v1471_v40 = vpop.f32.mrf.mxu0  ;;  %v1485_v41 = vpop.f32.mrf.mxu1 }
 0x1c3   : > { %v1490_v60 = vadd.f32 %v1471_v40, %v1435_v54  ;;  %v1491_v61 = vadd.f32 %v1485_v41, %v1436_v55 }
 0x1c5   : > { %v1545_v0 = vadd.f32 %v1526_v56, %v1490_v60  ;;  %v1546_v1 = vadd.f32 %v1540_v57, %v1491_v61 }
 0x1c9   : > { %v1528_v16 = vpop.f32.mrf.mxu2  ;;  %v1542_v17 = vpop.f32.mrf.mxu3 }
 0x1ca   : > { %v1473_v52 = vpop.f32.mrf.mxu0  ;;  %v1487_v53 = vpop.f32.mrf.mxu1 }
 0x1cb   : > { %v1492_v12 = vadd.f32 %v1473_v52, %v1437_v8  ;;  %v1493_v13 = vadd.f32 %v1487_v53, %v1438_v9 }
 0x1cd   : > { %v1547_v18 = vadd.f32 %v1528_v16, %v1492_v12  ;;  %v1548_v19 = vadd.f32 %v1542_v17, %v1493_v13 }
 0x1d2   : > { %v1581_v3 = vpop.f32.mrf.mxu0  ;;  %v1595_v4 = vpop.f32.mrf.mxu1 }
 0x1d3   : > { %v1600_v10 = vadd.f32 %v1581_v3, %v1545_v0  ;;  %v1601_v11 = vadd.f32 %v1595_v4, %v1546_v1 }
 0x1d5   : > { %v1604_v14 = vadd.f32 %v1600_v10, %v227_v2  ;;  %v1605_v15 = vadd.f32 %v1601_v11, %v227_v2 }
 0x1d7   : > { %1608 = vst [vmem:[%s170_s24] sm:$0xff] %v1604_v14 }
 0x1d8   : > { %1609 = vst [vmem:[%s170_s24 + $0x8] sm:$0xff] %v1605_v15 }
 0x1da   : > { %v1583_v21 = vpop.f32.mrf.mxu0  ;;  %v1597_v22 = vpop.f32.mrf.mxu1 }
 0x1db   : > { %v1602_v23 = vadd.f32 %v1583_v21, %v1547_v18  ;;  %v1603_v24 = vadd.f32 %v1597_v22, %v1548_v19 }
 0x1dd   : > { %v1606_v25 = vadd.f32 %v1602_v23, %v232_v20  ;;  %v1607_v26 = vadd.f32 %v1603_v24, %v232_v20 }
 0x1df   : > { %1610 = vst [vmem:[%s170_s24 + $0x10] sm:$0xff] %v1606_v25 }
 0x1e0   : > { %1611 = vst [vmem:[%s170_s24 + $0x18] sm:$0xff] %v1607_v26 }
 0x1e1 PF: > { %s13_s12 = sadd.s32 1, %s1895_s12  }
 0x1e2   : > { %p10_p4 = scmp.ge.s32.totalorder %s13_s12, 4  }
 0x1e4   :  { %12 = sbr.rel (!%p10_p4) target bundleno = 1 (0x1), region = 62 }

</bundles_post_ra>
